<compile_context>
chip_gen: v6e
topology: v6e:2x2x1
jax: 0.10.0
libtpu: 0.0.40
codegen_flags: <defaults>
</compile_context>

<pallas_src>
import functools

import jax
import jax.numpy as jnp
import numpy as np
from jax.experimental import pallas as pl
from jax.experimental.pallas import tpu as pltpu


# ---------------------------------------------------------------------------
# Per-generation configuration
# ---------------------------------------------------------------------------
@functools.lru_cache(maxsize=None)
def _hw_config():
    """Returns (vmem_limit_bytes, max_tm, max_tn) per TPU generation."""
    vmem_cap = None
    try:
        vmem_cap = getattr(pltpu.get_tpu_info(), "vmem_capacity_bytes", None)
    except Exception:
        pass
    if vmem_cap is None:
        return 32 * 1024 * 1024, 256, 512          # unknown -> safe everywhere
    if vmem_cap >= 100 * 1024 * 1024:
        return 64 * 1024 * 1024, 512, 1024         # v5e / v6e (128 MiB VMEM)
    return 48 * 1024 * 1024, 256, 512              # v7x (64 MiB VMEM per TC)


_K_CANDIDATES = (2048, 1024, 512, 256, 128)        # big K tile amortizes acc traffic
_N_CANDIDATES = (1024, 512, 256, 128)


def _choose_tile(dim, candidates, max_tile, min_blocks=1):
    """Largest candidate <= max_tile dividing dim, preferring >= min_blocks blocks."""
    cands = [c for c in candidates if c <= max_tile]
    for t in cands:
        if dim % t == 0 and dim // t >= min_blocks:
            return t
    for t in cands:
        if dim % t == 0:
            return t
    return dim  # full-dim block (legal BlockSpec); only for odd static weight dims


def _choose_m_tile(M, max_tm):
    """M tile: cap at max_tm, round small token counts up to a sublane multiple."""
    if M >= max_tm:
        return max_tm
    return max(8, ((M + 7) // 8) * 8)


# ---------------------------------------------------------------------------
# Kernel 1: fused gate_up GEMM + SiluAndMul epilogue
#   grid = (M/tm, I/tn, K/tk); two f32 accumulators (gate, up) live in VMEM,
#   the activation is applied once per output tile at the last K step, so the
#   (T, 2*intermediate) gate_up tensor never touches HBM.
# ---------------------------------------------------------------------------
def _gate_up_silu_kernel(x_ref, wg_ref, wu_ref, o_ref, accg_ref, accu_ref):
    @pl.when(pl.program_id(2) == 0)
    def _():
        accg_ref[...] = jnp.zeros_like(accg_ref)
        accu_ref[...] = jnp.zeros_like(accu_ref)

    x = x_ref[...]  # single load feeds both MXU pushes; operands stay in input dtype
    accg_ref[...] += jnp.dot(x, wg_ref[...], preferred_element_type=jnp.float32)
    accu_ref[...] += jnp.dot(x, wu_ref[...], preferred_element_type=jnp.float32)

    @pl.when(pl.program_id(2) == pl.num_programs(2) - 1)
    def _():
        g = accg_ref[...]
        u = accu_ref[...]
        # SiluAndMul: silu(gate) * up, computed in f32 (VPU + EUP sigmoid).
        o_ref[...] = (u * g * jax.nn.sigmoid(g)).astype(o_ref.dtype)


def gate_up_silu(x, w_gate, w_up, *, tm, tn, tk):
    M, K = x.shape
    N = w_gate.shape[1]
    itemsize = jnp.dtype(x.dtype).itemsize
    cost = pl.CostEstimate(
        flops=int(4 * M * K * N + 4 * M * N),
        transcendentals=int(M * N),
        bytes_accessed=int(itemsize * (M * K + 2 * K * N + M * N)),
    )
    return pl.pallas_call(
        _gate_up_silu_kernel,
        out_shape=jax.ShapeDtypeStruct((M, N), x.dtype),
        grid_spec=pltpu.PrefetchScalarGridSpec(
            num_scalar_prefetch=0,
            grid=(M // tm, N // tn, K // tk),
            in_specs=[
                pl.BlockSpec((tm, tk), lambda i, j, k: (i, k)),
                pl.BlockSpec((tk, tn), lambda i, j, k: (k, j)),
                pl.BlockSpec((tk, tn), lambda i, j, k: (k, j)),
            ],
            out_specs=pl.BlockSpec((tm, tn), lambda i, j, k: (i, j)),
            scratch_shapes=[
                pltpu.VMEM((tm, tn), jnp.float32),
                pltpu.VMEM((tm, tn), jnp.float32),
            ],
        ),
        compiler_params=pltpu.CompilerParams(
            dimension_semantics=("parallel", "parallel", "arbitrary"),
            vmem_limit_bytes=_hw_config()[0],
        ),
        cost_estimate=cost,
    )(x, w_gate, w_up)


# ---------------------------------------------------------------------------
# Kernel 2: plain tiled GEMM (down_proj, bias=False)
# ---------------------------------------------------------------------------
def _matmul_kernel(x_ref, w_ref, o_ref, acc_ref):
    @pl.when(pl.program_id(2) == 0)
    def _():
        acc_ref[...] = jnp.zeros_like(acc_ref)

    acc_ref[...] += jnp.dot(x_ref[...], w_ref[...],
                            preferred_element_type=jnp.float32)

    @pl.when(pl.program_id(2) == pl.num_programs(2) - 1)
    def _():
        o_ref[...] = acc_ref[...].astype(o_ref.dtype)


def down_matmul(x, w, *, tm, tn, tk):
    M, K = x.shape
    N = w.shape[1]
    itemsize = jnp.dtype(x.dtype).itemsize
    cost = pl.CostEstimate(
        flops=int(2 * M * K * N),
        transcendentals=0,
        bytes_accessed=int(itemsize * (M * K + K * N + M * N)),
    )
    return pl.pallas_call(
        _matmul_kernel,
        out_shape=jax.ShapeDtypeStruct((M, N), x.dtype),
        grid_spec=pltpu.PrefetchScalarGridSpec(
            num_scalar_prefetch=0,
            grid=(M // tm, N // tn, K // tk),
            in_specs=[
                pl.BlockSpec((tm, tk), lambda i, j, k: (i, k)),
                pl.BlockSpec((tk, tn), lambda i, j, k: (k, j)),
            ],
            out_specs=pl.BlockSpec((tm, tn), lambda i, j, k: (i, j)),
            scratch_shapes=[pltpu.VMEM((tm, tn), jnp.float32)],
        ),
        compiler_params=pltpu.CompilerParams(
            dimension_semantics=("parallel", "parallel", "arbitrary"),
            vmem_limit_bytes=_hw_config()[0],
        ),
        cost_estimate=cost,
    )(x, w)


# ---------------------------------------------------------------------------
# Module-level forward
# ---------------------------------------------------------------------------
def pangu_mlp_forward(x, params, *, tiles=None):
    """PanguProMoEMLP.forward: SiluAndMul(x @ W_gate_up) @ W_down  (tp_size == 1)."""
    w_gate, w_up, w_down = params["w_gate"], params["w_up"], params["w_down"]
    M, K = x.shape
    I = w_gate.shape[1]
    H = w_down.shape[1]
    _, max_tm, max_tn = _hw_config()

    if tiles is None:
        tm = _choose_m_tile(M, max_tm)
        # min_blocks=2 on the parallel N axes keeps both v7x TensorCores busy.
        tn1 = _choose_tile(I, _N_CANDIDATES, max_tn, min_blocks=2)
        tk1 = _choose_tile(K, _K_CANDIDATES, 2048)
        tn2 = _choose_tile(H, _N_CANDIDATES, max_tn, min_blocks=2)
        tk2 = _choose_tile(I, _K_CANDIDATES, 2048)
    else:
        tm, tn1, tk1, tn2, tk2 = tiles

    # Pad the ragged token dimension to a multiple of tm (zero rows stay zero
    # through silu(0)*0 and the down GEMM; sliced off at the end).
    pad = (-M) % tm
    x_p = jnp.pad(x, ((0, pad), (0, 0))) if pad else x

    h = gate_up_silu(x_p, w_gate, w_up, tm=tm, tn=tn1, tk=tk1)
    out = down_matmul(h, w_down, tm=tm, tn=tn2, tk=tk2)
    return out[:M] if pad else out


# ---------------------------------------------------------------------------
# Pure-JAX reference (computed in f32 regardless of input dtype)
# ---------------------------------------------------------------------------
def reference_forward(x, params):
    xf = x.astype(jnp.float32)
    gate = xf @ params["w_gate"].astype(jnp.float32)
    up = xf @ params["w_up"].astype(jnp.float32)
    h = jax.nn.silu(gate) * up
    return h @ params["w_down"].astype(jnp.float32)


# ---------------------------------------------------------------------------
if __name__ == "__main__":
    hidden_size = 256
    intermediate_size = 512
    T = 300  # deliberately not a multiple of any tile -> exercises the padding path

    key = jax.random.PRNGKey(0)
    k0, k1, k2, k3 = jax.random.split(key, 4)

    params_f32 = {
        # MergedColumnParallelLinear weight [gate; up] split into its two halves,
        # stored (in_features, out_features) so kernels compute x @ W.
        "w_gate": (0.05 * jax.random.normal(k0, (hidden_size, intermediate_size))).astype(jnp.float32),
        "w_up":   (0.05 * jax.random.normal(k1, (hidden_size, intermediate_size))).astype(jnp.float32),
        "w_down": (0.05 * jax.random.normal(k2, (intermediate_size, hidden_size))).astype(jnp.float32),
    }
    x_f32 = jax.random.normal(k3, (T, hidden_size), dtype=jnp.float32)

    # --- Test 1: f32, forced small tiles so the multi-block K/M/N accumulator
    #             paths and the ragged-M padding are all exercised. ---
    out = jax.block_until_ready(
        pangu_mlp_forward(x_f32, params_f32, tiles=(128, 128, 128, 128, 128)))
    ref = reference_forward(x_f32, params_f32)
    np.testing.assert_allclose(np.asarray(out), np.asarray(ref), rtol=2e-3, atol=2e-3)

    # --- Test 2: bf16 production path with auto (per-generation) tiling. ---
    params_bf16 = jax.tree_util.tree_map(lambda w: w.astype(jnp.bfloat16), params_f32)
    x_bf16 = x_f32.astype(jnp.bfloat16)
    out_bf = jax.block_until_ready(pangu_mlp_forward(x_bf16, params_bf16))
    ref_bf = reference_forward(x_bf16, params_bf16)
    np.testing.assert_allclose(np.asarray(out_bf, dtype=np.float32),
                               np.asarray(ref_bf), rtol=5e-2, atol=5e-2)

    print("KERNEL_OK")
</pallas_src>

<mosaic_0001>
module attributes {stable_mosaic.version = 11 : i64} {
  func.func @_gate_up_silu_kernel(%arg0: i32, %arg1: i32, %arg2: i32, %arg3: memref<128x128xf32, #tpu.memory_space<vmem>>, %arg4: memref<128x128xf32, #tpu.memory_space<vmem>>, %arg5: memref<128x128xf32, #tpu.memory_space<vmem>>, %arg6: memref<128x128xf32, #tpu.memory_space<vmem>>, %arg7: memref<128x128xf32, #tpu.memory_space<vmem>>, %arg8: memref<128x128xf32, #tpu.memory_space<vmem>>) attributes {dimension_semantics = [#tpu.dimension_semantics<parallel>, #tpu.dimension_semantics<parallel>, #tpu.dimension_semantics<arbitrary>], iteration_bounds = array<i64: 3, 4, 2>, scalar_prefetch = 0 : i64, scratch_operands = 2 : i64, tpu.core_type = #tpu.core_type<tc>, window_params = [{transform_indices = @transform_0, window_bounds = array<i64: 128, 128>}, {transform_indices = @transform_1, window_bounds = array<i64: 128, 128>}, {transform_indices = @transform_2, window_bounds = array<i64: 128, 128>}, {transform_indices = @transform_3, window_bounds = array<i64: 128, 128>}]} {
    %c0_i32 = arith.constant 0 : i32
    %0 = arith.cmpi eq, %arg2, %c0_i32 : i32
    %1 = arith.extui %0 : i1 to i32
    %c0_i32_0 = arith.constant 0 : i32
    %2 = arith.cmpi ne, %1, %c0_i32_0 : i32
    scf.if %2 {
      %cst_16 = arith.constant 0.000000e+00 : f32
      %17 = vector.broadcast %cst_16 : f32 to vector<128x128xf32>
      %c0_17 = arith.constant 0 : index
      %c0_18 = arith.constant 0 : index
      %18 = vector.load %arg7[%c0_17, %c0_18] : memref<128x128xf32, #tpu.memory_space<vmem>>, vector<128x128xf32>
      tpu.vector_store %arg7[%c0_17, %c0_18], %17 {strides = array<i32>} : memref<128x128xf32, #tpu.memory_space<vmem>>, vector<128x128xf32>,
      %cst_19 = arith.constant 0.000000e+00 : f32
      %19 = vector.broadcast %cst_19 : f32 to vector<128x128xf32>
      %c0_20 = arith.constant 0 : index
      %c0_21 = arith.constant 0 : index
      %20 = vector.load %arg8[%c0_20, %c0_21] : memref<128x128xf32, #tpu.memory_space<vmem>>, vector<128x128xf32>
      tpu.vector_store %arg8[%c0_20, %c0_21], %19 {strides = array<i32>} : memref<128x128xf32, #tpu.memory_space<vmem>>, vector<128x128xf32>,
    } else {
    }
    %c0 = arith.constant 0 : index
    %c0_1 = arith.constant 0 : index
    %3 = vector.load %arg3[%c0, %c0_1] : memref<128x128xf32, #tpu.memory_space<vmem>>, vector<128x128xf32>
    %c0_2 = arith.constant 0 : index
    %c0_3 = arith.constant 0 : index
    %4 = vector.load %arg7[%c0_2, %c0_3] : memref<128x128xf32, #tpu.memory_space<vmem>>, vector<128x128xf32>
    %c0_4 = arith.constant 0 : index
    %c0_5 = arith.constant 0 : index
    %5 = vector.load %arg4[%c0_4, %c0_5] : memref<128x128xf32, #tpu.memory_space<vmem>>, vector<128x128xf32>
    %cst = arith.constant dense<0.000000e+00> : vector<128x128xf32>
    %6 = tpu.matmul %3, %5, %cst {dimension_numbers = #tpu.dot_dimension_numbers<[1], [0], [0], [1], [0, 0, 1, 1], [], []>} : vector<128x128xf32>, vector<128x128xf32>, vector<128x128xf32> -> vector<128x128xf32>
    %7 = arith.addf %4, %6 : vector<128x128xf32>
    %c0_6 = arith.constant 0 : index
    %c0_7 = arith.constant 0 : index
    %8 = vector.load %arg7[%c0_6, %c0_7] : memref<128x128xf32, #tpu.memory_space<vmem>>, vector<128x128xf32>
    tpu.vector_store %arg7[%c0_6, %c0_7], %7 {strides = array<i32>} : memref<128x128xf32, #tpu.memory_space<vmem>>, vector<128x128xf32>,
    %c0_8 = arith.constant 0 : index
    %c0_9 = arith.constant 0 : index
    %9 = vector.load %arg8[%c0_8, %c0_9] : memref<128x128xf32, #tpu.memory_space<vmem>>, vector<128x128xf32>
    %c0_10 = arith.constant 0 : index
    %c0_11 = arith.constant 0 : index
    %10 = vector.load %arg5[%c0_10, %c0_11] : memref<128x128xf32, #tpu.memory_space<vmem>>, vector<128x128xf32>
    %cst_12 = arith.constant dense<0.000000e+00> : vector<128x128xf32>
    %11 = tpu.matmul %3, %10, %cst_12 {dimension_numbers = #tpu.dot_dimension_numbers<[1], [0], [0], [1], [0, 0, 1, 1], [], []>} : vector<128x128xf32>, vector<128x128xf32>, vector<128x128xf32> -> vector<128x128xf32>
    %12 = arith.addf %9, %11 : vector<128x128xf32>
    %c0_13 = arith.constant 0 : index
    %c0_14 = arith.constant 0 : index
    %13 = vector.load %arg8[%c0_13, %c0_14] : memref<128x128xf32, #tpu.memory_space<vmem>>, vector<128x128xf32>
    tpu.vector_store %arg8[%c0_13, %c0_14], %12 {strides = array<i32>} : memref<128x128xf32, #tpu.memory_space<vmem>>, vector<128x128xf32>,
    %c1_i32 = arith.constant 1 : i32
    %14 = arith.cmpi eq, %arg2, %c1_i32 : i32
    %15 = arith.extui %14 : i1 to i32
    %c0_i32_15 = arith.constant 0 : i32
    %16 = arith.cmpi ne, %15, %c0_i32_15 : i32
    scf.if %16 {
      %c0_16 = arith.constant 0 : index
      %c0_17 = arith.constant 0 : index
      %17 = vector.load %arg7[%c0_16, %c0_17] : memref<128x128xf32, #tpu.memory_space<vmem>>, vector<128x128xf32>
      %c0_18 = arith.constant 0 : index
      %c0_19 = arith.constant 0 : index
      %18 = vector.load %arg8[%c0_18, %c0_19] : memref<128x128xf32, #tpu.memory_space<vmem>>, vector<128x128xf32>
      %19 = arith.mulf %18, %17 : vector<128x128xf32>
      %20 = arith.negf %17 : vector<128x128xf32>
      %21 = math.exp %20 : vector<128x128xf32>
      %cst_20 = arith.constant 1.000000e+00 : f32
      %22 = vector.broadcast %cst_20 : f32 to vector<128x128xf32>
      %23 = arith.addf %22, %21 : vector<128x128xf32>
      %24 = arith.divf %22, %23 : vector<128x128xf32>
      %25 = arith.mulf %19, %24 : vector<128x128xf32>
      %c0_21 = arith.constant 0 : index
      %c0_22 = arith.constant 0 : index
      %26 = vector.load %arg6[%c0_21, %c0_22] : memref<128x128xf32, #tpu.memory_space<vmem>>, vector<128x128xf32>
      tpu.vector_store %arg6[%c0_21, %c0_22], %25 {strides = array<i32>} : memref<128x128xf32, #tpu.memory_space<vmem>>, vector<128x128xf32>,
    } else {
    }
    return
  }
  func.func @transform_0(%arg0: i32, %arg1: i32, %arg2: i32) -> (i32, i32) {
    %c0_i32 = arith.constant 0 : i32
    return %arg0, %arg2 : i32, i32
  }
  func.func @transform_1(%arg0: i32, %arg1: i32, %arg2: i32) -> (i32, i32) {
    %c0_i32 = arith.constant 0 : i32
    return %arg2, %arg1 : i32, i32
  }
  func.func @transform_2(%arg0: i32, %arg1: i32, %arg2: i32) -> (i32, i32) {
    %c0_i32 = arith.constant 0 : i32
    return %arg2, %arg1 : i32, i32
  }
  func.func @transform_3(%arg0: i32, %arg1: i32, %arg2: i32) -> (i32, i32) {
    %c0_i32 = arith.constant 0 : i32
    return %arg0, %arg1 : i32, i32
  }
}

</mosaic_0001>

<bundles_post_ra>
// kernel: tpu_custom_call.1
= control target key start
LH: loop header
LB: loop body
LE: loop exit
PB: predicated region body
PF: predicated region fallthrough
CT: control target
= control target key end

     0   :  { %s2346_s0 = inlined_call_operand.hbm [shape: f32[384,256], index: 0, kind: input, shape index: {}]   ;;  %s2347_s1 = inlined_call_operand.hbm [shape: f32[256,512], index: 1, kind: input, shape index: {}]   ;;  %s2348_s2 = inlined_call_operand.hbm [shape: f32[256,512], index: 2, kind: input, shape index: {}]   ;;  %s2349_s3 = inlined_call_operand.hbm [shape: f32[384,512], index: 3, kind: output, shape index: {}]  }
   0x1   :  { %2369 = sst [smem:[#allocation27_spill]] %s2346_s0 }
   0x2   :  { %2370 = sst [smem:[#allocation28_spill]] %s2347_s1 }
   0x3   :  { %2371 = sst [smem:[#allocation29_spill]] %s2348_s2 }
   0x4   :  { %2372 = sst [smem:[#allocation30_spill]] %s2349_s3 }
   0x5   :  { %8 = vsyncpa [#allocation5], 0 }
   0x6   :  { %10 = vsyncpa [#allocation5 + $0x1], 0 }
   0x7   :  { %11 = vsyncpa [#allocation8], 0 }
   0x8   :  { %13 = vsyncpa [#allocation8 + $0x1], 0 }
   0x9   :  { %14 = vsyncpa [#allocation6], 0 }
   0xa   :  { %16 = vsyncpa [#allocation6 + $0x1], 0  ;;  %s1841_s12 = smov 0   ;;  %s1843_s13 = smov 0  }
   0xb   :  { %s1845_s14 = smov 0   ;;  %s1847_s15 = smov 0  }
   0xc   :  { %s1849_s16 = smov 0   ;;  %s1851_s17 = smov 0  }
   0xd   :  { %s1853_s18 = smov 0   ;;  %s1855_s19 = smov 0  }
   0xe   :  { %s1857_s20 = smov 0   ;;  %s1859_s21 = smov 0  }
   0xf   :  { %s1861_s22 = smov 0   ;;  %s1863_s23 = smov 0  }
  0x10   :  { %s1865_s24 = smov 0   ;;  %s1867_s25 = smov 0  }
  0x11   :  { %s1869_s26 = smov 0   ;;  %s1871_s27 = smov 0  }
  0x12 LB: > { %2373 = sst [smem:[#allocation14_spill]] %s1747_s12  ;;  %s34_s28 = sadd.s32 1, %s1795_s24  ;;  %s1807_s27 = sphi %s1871_s27, %s22_s27   ;;  %s1803_s26 = sphi %s1869_s26, %s2433_s26   ;;  %s1799_s25 = sphi %s1867_s25, %s2421_s25   ;;  %s1795_s24 = sphi %s1865_s24, %s2432_s24   ;;  %s1791_s23 = sphi %s1863_s23, %s2431_s23   ;;  %s1787_s22 = sphi %s1861_s22, %s2419_s22   ;;  %s1783_s21 = sphi %s1859_s21, %s2430_s21   ;;  %s1779_s20 = sphi %s1857_s20, %s2429_s20   ;;  %s1775_s19 = sphi %s1855_s19, %s2428_s19   ;;  %s1771_s18 = sphi %s1853_s18, %s2427_s18   ;;  %s1767_s17 = sphi %s1851_s17, %s2418_s17   ;;  %s1763_s16 = sphi %s1849_s16, %s2417_s16   ;;  %s1759_s15 = sphi %s1847_s15, %s2416_s15   ;;  %s1755_s14 = sphi %s1845_s14, %s2426_s14   ;;  %s1751_s13 = sphi %s1843_s13, %s2425_s13   ;;  %s1747_s12 = sphi %s1841_s12, %s2423_s12  }
  0x13   : > { %2374 = sst [smem:[#allocation15_spill]] %s1763_s16  ;;  %p35_p0 = scmp.ge.s32.totalorder %s34_s28, 2 }
  0x14   : > { %2375 = sst [smem:[#allocation16_spill]] %s1767_s17  ;;  %s37_s29 = sadd.s32 1, %s1799_s25 }
  0x15   : > { %2376 = sst [smem:[#allocation17_spill]] %s1783_s21  ;;  %s1922_s30 = sadd.s32 4294967295, %s1807_s27  }
  0x16   : > { %2377 = sst [smem:[#allocation18_spill]] %s1787_s22  ;;  %p58_p1 = scmp.eq.s32.totalorder %s1807_s27, 0 }
  0x17   : > { %2378 = sst [smem:[#allocation19_spill]] %s1791_s23  ;;  %s2435_s28 = smov (%p35_p0, %s34_s28), 0 }
  0x18   : > { %2379 = sst [smem:[#allocation20_spill]] %s1799_s25  ;;  %s2437_s29 = smov (!%p35_p0, %s37_s29), %s1799_s25 }
  0x19   : > { %2380 = sst [smem:[#allocation21_spill]] %s2435_s28  ;;  %s1932_s4 = ssub.s32 %s1795_s24, %s2435_s28 }
  0x1a   : > { %p64_p2 = scmp.eq.s32.totalorder %s1922_s30, 0  ;;  %p39_p3 = scmp.ge.s32.totalorder %s2437_s29, 4 }
  0x1b   : > { %p85_p4 = scmp.ne.s32.totalorder %s1767_s17, %s1763_s16  ;;  %s78_s5 = sadd.s32 1, %s1767_s17 }
  0x1c   : > { %p91_p5 = scmp.ne.s32.totalorder %s1763_s16, %s1759_s15  ;;  %p2356_p8 = scmp.lt.s32.totalorder %s1807_s27, 24 }
  0x1d   : > { %s1943_s6 = scalar_select %p39_p3, 0, %s2437_s29  }
  0x1e   : > { %p1947_p6 = por %p85_p4, %p58_p1  ;;  %p1953_p7 = por %p91_p5, %p64_p2 }
  0x1f   : > { %2381 = sst [smem:[#allocation22_spill]] %s1943_s6  ;;  %s1959_s9 = ssub.s32 %s1799_s25, %s1943_s6 }
  0x20   : > { %s2383_s8 = scalar_select %p1953_p7, 1, 0 }
  0x21   : > { %s75_s10 = sor.u32 %s1959_s9, %s1932_s4  ;;  %s194_s11 = sand.u32 1, %s1807_s27  }
  0x22   : > { %2384 = sst [smem:[#allocation23_spill]] %s2383_s8  ;;  %p76_p9 = scmp.eq.s32.totalorder %s75_s10, 0 }
  0x23   : > { %s196_s28 = sand.u32 1, %s1767_s17   ;;  %s1156_s22 = sshll.u32 %s1795_s24, 6 }
  0x24   : > { %s1966_s15 = scalar_select %p76_p9, %s1767_s17, %s78_s5  }
  0x25   : > { %s1969_s3 = sshll.u32 %s196_s28, 7  ;;  %s204_s23 = sadd.s32 %s1799_s25, %s1156_s22 }
  0x26   : > { %2385 = sst [smem:[#allocation24_spill]] %s1966_s15  ;;  %s1121_s21 = sshll.u32 %s204_s23, 7 }
  0x27   : > { %s198_s8 = scalar_lea.vmem [#allocation7], %s1969_s3  ;;  %s2386_s1 = sld [smem:[#allocation28_spill]] }
  0x28   : > { %s207_s16 = sshll.u32 %s198_s8, 4  ;;  %p1981_p10 = pnand %p2356_p8, %p1947_p6  ;;  %s208_s16 = int_to_ptr.vmem [resolvable:$true] %s207_s16 }
  0x29   : > { %p145_p11 = scmp.eq.s32.totalorder %s1922_s30, 23  ;;  %s2388_s2 = sld [smem:[#allocation29_spill]] }
  0x2a   : > { %s1991_s23 = scalar_lea.sflag [#allocation8], %s194_s11  ;;  %p2367_p12 = pneg %p1981_p10 }
  0x2b   : > { %s1572_s0 = scalar_lea.vmem %s208_s16, 2048  ;;  %s1809_s6 = smov [#allocation7]  }
  0x2c   : > { %p1573_p13 = scmp.ne.s32.totalorder %s208_s16, %s1572_s0  ;;  %s1577_s7 = sshll.u32 %s1809_s6, 4  ;;  %s1578_s7 = int_to_ptr.vmem [resolvable:$false] %s1577_s7 }
  0x2d   : > { %s206_s12 = scalar_lea.hbm %s2386_s1, %s1121_s21  ;;  %s1579_s8 = scalar_lea.vmem %s1578_s7, 4096 }
  0x2e   : > { %p1575_p0 = pnand %p1573_p13, %p2367_p12  ;;  %p1580_p5 = scmp.lt.s32.totalorder %s208_s16, %s1578_s7 }
  0x2f   : > { %s1989_s22 = scalar_lea.hbm %s2388_s2, %s1121_s21  ;;  %p1581_p6 = scmp.lt.s32.totalorder %s1579_s8, %s1572_s0 }
  0x30   : > { %p1576_p4 = pneg %p1575_p0 }
  0x31   : > { %p1582_p9 = por %p1581_p6, %p1580_p5 }
  0x33   : > { %p1583_p8 = pnand %p1582_p9, %p1576_p4 }
  0x35   : > { %1586 = shalt.err (!%p1583_p8)
}
  0x36   : > { %s2357_s21 = smov 512   ;;  %s2358_s11 = smov 128  }
  0x37   : > { %s2360_s28 = smov 8   ;;  %s221_s5 = scalar_lea.vmem [#allocation9], %s1969_s3 }
  0x38   : > { %1349 = dma.hbm_to_vmem [thread:$0]  (!%p1981_p10), %s206_s12, 2048, %s208_s16, %s1991_s23, %s2357_s21, %s2358_s11, %s2360_s28  }
  0x39   : > { %s2005_s0 = sshll.u32 %s221_s5, 4  ;;  %p1126_p8 = scmp.ge.s32.totalorder %s1807_s27, 1  ;;  %s2077_s0 = int_to_ptr.vmem [resolvable:$true] %s2005_s0 }
  0x3a   : > { %s2389_s6 = sld [smem:[#allocation14_spill]]  ;;  %p238_p13 = scmp.lt.s32.totalorder %s1807_s27, 25 }
  0x3b   : > { %s1111_s8 = sadd.s32 4294967294, %s1807_s27   ;;  %s41_s1 = sadd.s32 1, %s1803_s26 }
  0x3c   : > { %p2009_p0 = pnand %p1126_p8, %p238_p13  ;;  %s2439_s1 = smov (!%p39_p3, %s41_s1), %s1803_s26 }
  0x3d   : > { %s50_s3 = sadd.s32 1, %s1779_s20  ;;  %p57_p4 = scmp.ne.s32.totalorder %s1779_s20, %s1775_s19 }
  0x3e   : > { %p43_p5 = scmp.ge.s32.totalorder %s2439_s1, 3  ;;  %p63_p6 = scmp.ne.s32.totalorder %s1775_s19, %s1771_s18 }
  0x3f   : > { %p2025_p9 = por %p58_p1, %p57_p4  ;;  %s134_s16 = sadd.s32 1, %s1755_s14 }
  0x40   : > { %s2441_s1 = smov (%p43_p5, %s2439_s1), 0  ;;  %p2034_p3 = por %p64_p2, %p63_p6 }
  0x41   : > { %2392 = sst [smem:[#allocation25_spill]] %s2441_s1  ;;  %p144_p8 = scmp.ne.s32.totalorder %s1755_s14, %s1751_s13 }
  0x42   : > { %s45_s5 = ssub.s32 %s1803_s26, %s2441_s1  ;;  %p150_p13 = scmp.ne.s32.totalorder %s1751_s13, %s2389_s6 }
  0x43   : > { %s47_s18 = sor.u32 %s1932_s4, %s45_s5  ;;  %s131_s21 = sor.u32 %s1959_s9, %s45_s5 }
  0x44   : > { %p48_p1 = scmp.eq.s32.totalorder %s47_s18, 0  ;;  %p132_p4 = scmp.eq.s32.totalorder %s131_s21, 0 }
  0x45   : > { %p2048_p5 = por %p145_p11, %p144_p8  ;;  %p151_p2 = scmp.eq.s32.totalorder %s1111_s8, 23 }
  0x46   : > { %s2053_s28 = scalar_select %p48_p1, %s1779_s20, %s50_s3  }
  0x47   : > { %s2394_s11 = scalar_select %p2048_p5, 1, 0 }
  0x48   : > { %s2056_s2 = scalar_select %p132_p4, %s1755_s14, %s134_s16  }
  0x49   : > { %2395 = sst [smem:[#allocation26_spill]] %s2394_s11  ;;  %p2058_p6 = por %p151_p2, %p150_p13 }
  0x4a   : > { %s171_s4 = sand.u32 1, %s1779_s20   ;;  %s1155_s6 = sshll.u32 %s1803_s26, 5 }
  0x4b   : > { %s2396_s1 = scalar_select %p2058_p6, 1, 0 }
  0x4c   : > { %s1114_s9 = sshll.u32 %s171_s4, 7  ;;  %s181_s5 = sadd.s32 %s1795_s24, %s1155_s6 }
  0x4d   : > { %s175_s21 = scalar_lea.vmem [#allocation4], %s1114_s9  ;;  %s1117_s25 = sshll.u32 %s181_s5, 7 }
  0x4e   : > { %s184_s18 = sshll.u32 %s175_s21, 4  ;;  %s2397_s11 = sld [smem:[#allocation27_spill]]  ;;  %s185_s18 = int_to_ptr.vmem [resolvable:$true] %s184_s18 }
  0x4f   : > { %p2398_p11 = scmp.lt.s32.totalorder %s1807_s27, 24  ;;  %s172_s16 = scalar_lea.sflag [#allocation5], %s171_s4 }
  0x50   : > { %s1600_s9 = scalar_lea.vmem %s185_s18, 2048  ;;  %s1813_s6 = smov [#allocation4]  }
  0x51   : > { %p2072_p8 = pnand %p2398_p11, %p2025_p9  ;;  %p1601_p1 = scmp.ne.s32.totalorder %s185_s18, %s1600_s9 }
  0x52   : > { %s1605_s5 = sshll.u32 %s1813_s6, 4  ;;  %s1606_s5 = int_to_ptr.vmem [resolvable:$false] %s1605_s5 }
  0x53   : > { %p1589_p13 = pneg %p2072_p8  ;;  %s1607_s17 = scalar_lea.vmem %s1606_s5, 4096 }
  0x54   : > { %s183_s8 = scalar_lea.hbm %s2397_s11, %s1117_s25  ;;  %p1608_p12 = scmp.lt.s32.totalorder %s185_s18, %s1606_s5 }
  0x55   : > { %p1603_p4 = pnand %p1601_p1, %p1589_p13  ;;  %p1609_p6 = scmp.lt.s32.totalorder %s1607_s17, %s1600_s9 }
  0x57   : > { %p1604_p2 = pneg %p1603_p4  ;;  %p1610_p9 = por %p1609_p6, %p1608_p12 }
  0x59   : > { %p1611_p11 = pnand %p1610_p9, %p1604_p2 }
  0x5b   : > { %1614 = shalt.err (!%p1611_p11)
}
  0x5c   : > { %s1814_s25 = smov 256   ;;  %s2400_s15 = smov 8  }
  0x5d   : > { %s2401_s11 = smov 128   ;;  %s1628_s12 = scalar_lea.vmem %s2077_s0, 2048 }
  0x5e   : > { %1346 = dma.hbm_to_vmem [thread:$0]  (!%p2072_p8), %s183_s8, 2048, %s185_s18, %s172_s16, %s1814_s25, %s2401_s11, %s2400_s15  }
  0x5f   : > { %p1629_p13 = scmp.ne.s32.totalorder %s2077_s0, %s1628_s12  ;;  %p2402_p1 = pneg %p1981_p10 }
  0x60   : > { %s1815_s4 = smov [#allocation9]  }
  0x61   : > { %p1631_p4 = pnand %p1629_p13, %p2402_p1  ;;  %s1633_s21 = sshll.u32 %s1815_s4, 4  ;;  %s1634_s21 = int_to_ptr.vmem [resolvable:$false] %s1633_s21 }
  0x62   : > { %s1635_s9 = scalar_lea.vmem %s1634_s21, 4096  ;;  %p1636_p12 = scmp.lt.s32.totalorder %s2077_s0, %s1634_s21 }
  0x63   : > { %p1632_p5 = pneg %p1631_p4  ;;  %p1637_p6 = scmp.lt.s32.totalorder %s1635_s9, %s1628_s12 }
  0x65   : > { %p1638_p2 = por %p1637_p6, %p1636_p12 }
  0x67   : > { %p1639_p9 = pnand %p1638_p2, %p1632_p5 }
  0x69   : > { %1642 = shalt.err (!%p1639_p9)
}
  0x6a   : > { %s2403_s18 = smov 512   ;;  %242 = sbr.rel (%p2009_p0) target bundleno = 495 (0x1ef), region = 32 }
  0x6b   : > { %1352 = dma.hbm_to_vmem [thread:$0]  (!%p1981_p10), %s1989_s22, 2048, %s2077_s0, %s1991_s23, %s2403_s18, %s2401_s11, %s2400_s15  }
  0x6c   : > { %s244_s8 = sand.u32 (!%p2009_p0), 1, %s1775_s19  }
  0x6d   : > { %s1127_s3 = sshll.u32 (!%p2009_p0), %s244_s8, 7  ;;  %s245_s16 = scalar_lea.sflag (!%p2009_p0), [#allocation5], %s244_s8 }
  0x6e   : > { %s2102_s6 = scalar_lea.vmem (!%p2009_p0), [#allocation4], %s1127_s3 }
  0x6f   : > { %1734 = dma.done.wait (%p2034_p3), %s245_s16, 2048  }
  0x70   : > { %1736 = vsyncadd (%p2034_p3), %s245_s16, 4294965248  ;;  %s2404_s10 = sld [smem:[#allocation15_spill]]  ;;  %s253_s17 = sand.u32 1, %s1922_s30  }
  0x71   : > { %s254_s0 = scalar_lea.sflag [#allocation8], %s253_s17 }
  0x76   : > { %s255_s22 = sand.u32 1, %s2404_s10  }
  0x77   : > { %s1128_s23 = sshll.u32 %s255_s22, 7 }
  0x78   : > { %s2110_s7 = scalar_lea.vmem [#allocation7], %s1128_s23 }
  0x79   : > { %1738 = dma.done.wait (%p1953_p7), %s254_s0, 4096  }
  0x7a   : > { %1740 = vsyncadd (%p1953_p7), %s254_s0, 4294963200  ;;  %s296_s25 = sand.u32 1, %s1751_s13   ;;  %s2119_s15 = scalar_lea.vmem [#allocation9], %s1128_s23 }
  0x7b   : > { %s1130_s29 = sshll.u32 %s296_s25, 7  ;;  %s2406_s30 = sld [smem:[#allocation17_spill]] }
  0x7c   : > { %s2121_s11 = scalar_lea.vmem [#allocation10], %s1130_s29 }
  0x81   : > { %p1131_p10 = scmp.ne.s32.totalorder %s2406_s30, 0 }
  0x83   : > { %306 = sbr.rel (%p1131_p10) target bundleno = 153 (0x99), region = 48 }
  0x88   : > { %v1816_v0 = vmov 0.0  }
  0x89   : > { %307 = vst [vmem:[#allocation2 + $0x30] sm:$0xff] %v1816_v0  ;;  %308 = vst [vmem:[#allocation2] sm:$0xff] %v1816_v0 }
  0x8a   : > { %309 = vst [vmem:[#allocation2 + $0x58] sm:$0xff] %v1816_v0  ;;  %310 = vst [vmem:[#allocation2 + $0x18] sm:$0xff] %v1816_v0 }
  0x8b   : > { %311 = vst [vmem:[#allocation2 + $0x50] sm:$0xff] %v1816_v0  ;;  %312 = vst [vmem:[#allocation2 + $0x68] sm:$0xff] %v1816_v0 }
  0x8c   : > { %313 = vst [vmem:[#allocation2 + $0x8] sm:$0xff] %v1816_v0  ;;  %314 = vst [vmem:[#allocation2 + $0x48] sm:$0xff] %v1816_v0 }
  0x8d   : > { %315 = vst [vmem:[#allocation2 + $0x40] sm:$0xff] %v1816_v0  ;;  %316 = vst [vmem:[#allocation2 + $0x20] sm:$0xff] %v1816_v0 }
  0x8e   : > { %317 = vst [vmem:[#allocation2 + $0x10] sm:$0xff] %v1816_v0  ;;  %318 = vst [vmem:[#allocation2 + $0x38] sm:$0xff] %v1816_v0 }
  0x8f   : > { %319 = vst [vmem:[#allocation2 + $0x60] sm:$0xff] %v1816_v0  ;;  %320 = vst [vmem:[#allocation2 + $0x70] sm:$0xff] %v1816_v0 }
  0x90   : > { %321 = vst [vmem:[#allocation2 + $0x78] sm:$0xff] %v1816_v0  ;;  %322 = vst [vmem:[#allocation2 + $0x28] sm:$0xff] %v1816_v0 }
  0x91   : > { %323 = vst [vmem:[#allocation3 + $0x28] sm:$0xff] %v1816_v0  ;;  %324 = vst [vmem:[#allocation3 + $0x68] sm:$0xff] %v1816_v0 }
  0x92   : > { %325 = vst [vmem:[#allocation3 + $0x10] sm:$0xff] %v1816_v0  ;;  %326 = vst [vmem:[#allocation3 + $0x40] sm:$0xff] %v1816_v0 }
  0x93   : > { %327 = vst [vmem:[#allocation3 + $0x48] sm:$0xff] %v1816_v0  ;;  %328 = vst [vmem:[#allocation3 + $0x30] sm:$0xff] %v1816_v0 }
  0x94   : > { %329 = vst [vmem:[#allocation3 + $0x70] sm:$0xff] %v1816_v0  ;;  %330 = vst [vmem:[#allocation3 + $0x38] sm:$0xff] %v1816_v0 }
  0x95   : > { %331 = vst [vmem:[#allocation3 + $0x20] sm:$0xff] %v1816_v0  ;;  %332 = vst [vmem:[#allocation3 + $0x78] sm:$0xff] %v1816_v0 }
  0x96   : > { %333 = vst [vmem:[#allocation3 + $0x18] sm:$0xff] %v1816_v0  ;;  %334 = vst [vmem:[#allocation3 + $0x58] sm:$0xff] %v1816_v0 }
  0x97   : > { %335 = vst [vmem:[#allocation3] sm:$0xff] %v1816_v0  ;;  %336 = vst [vmem:[#allocation3 + $0x8] sm:$0xff] %v1816_v0 }
  0x98   : > { %337 = vst [vmem:[#allocation3 + $0x60] sm:$0xff] %v1816_v0  ;;  %338 = vst [vmem:[#allocation3 + $0x50] sm:$0xff] %v1816_v0 }
  0x99 PF: > { %v386_v1 = vld [vmem:[%s2110_s7 + $0x78] sm:$0xff]  ;;  %v385_v3 = vld [vmem:[%s2110_s7 + $0x70] sm:$0xff]  ;;  %v384_v5 = vld [vmem:[%s2110_s7 + $0x68] sm:$0xff]  ;;  %s2407_s12 = sld [smem:[#allocation17_spill]] }
  0x9a   : > { %v595_v2 = vld [vmem:[%s2119_s15 + $0x78] sm:$0xff]  ;;  %1223 = vmatprep.subr.mxu0 %v386_v1  ;;  %v594_v4 = vld [vmem:[%s2119_s15 + $0x70] sm:$0xff]  ;;  %v593_v6 = vld [vmem:[%s2119_s15 + $0x68] sm:$0xff] }
  0x9b   : > { %1279 = vmatprep.subr.mxu1 %v595_v2  ;;  %1224 = vmatpush3.msra.mxu0 %v386_v1  ;;  %v383_v7 = vld [vmem:[%s2110_s7 + $0x60] sm:$0xff]  ;;  %v382_v9 = vld [vmem:[%s2110_s7 + $0x58] sm:$0xff]  ;;  %v381_v11 = vld [vmem:[%s2110_s7 + $0x50] sm:$0xff] }
  0x9c   : > { %1280 = vmatpush3.msra.mxu1 %v595_v2  ;;  %1225 = vmatprep.subr.mxu0 %v385_v3  ;;  %v592_v8 = vld [vmem:[%s2119_s15 + $0x60] sm:$0xff]  ;;  %v591_v10 = vld [vmem:[%s2119_s15 + $0x58] sm:$0xff]  ;;  %v590_v12 = vld [vmem:[%s2119_s15 + $0x50] sm:$0xff] }
  0x9d   : > { %1281 = vmatprep.subr.mxu1 %v594_v4  ;;  %1226 = vmatpush3.msra.mxu0 %v385_v3  ;;  %v380_v13 = vld [vmem:[%s2110_s7 + $0x48] sm:$0xff]  ;;  %v379_v15 = vld [vmem:[%s2110_s7 + $0x40] sm:$0xff]  ;;  %v378_v17 = vld [vmem:[%s2110_s7 + $0x38] sm:$0xff] }
  0x9e   : > { %1282 = vmatpush3.msra.mxu1 %v594_v4  ;;  %1227 = vmatprep.subr.mxu0 %v384_v5  ;;  %v589_v14 = vld [vmem:[%s2119_s15 + $0x48] sm:$0xff]  ;;  %v588_v16 = vld [vmem:[%s2119_s15 + $0x40] sm:$0xff]  ;;  %v587_v18 = vld [vmem:[%s2119_s15 + $0x38] sm:$0xff] }
  0x9f   : > { %1283 = vmatprep.subr.mxu1 %v593_v6  ;;  %1228 = vmatpush3.msra.mxu0 %v384_v5  ;;  %v377_v19 = vld [vmem:[%s2110_s7 + $0x30] sm:$0xff]  ;;  %v376_v21 = vld [vmem:[%s2110_s7 + $0x28] sm:$0xff]  ;;  %v375_v23 = vld [vmem:[%s2110_s7 + $0x20] sm:$0xff]  ;;  %p1132_p7 = scmp.ne.s32.totalorder %s2407_s12, 1 }
  0xa0   : > { %1284 = vmatpush3.msra.mxu1 %v593_v6  ;;  %1229 = vmatprep.subr.mxu0 %v383_v7  ;;  %v586_v20 = vld [vmem:[%s2119_s15 + $0x30] sm:$0xff]  ;;  %v585_v22 = vld [vmem:[%s2119_s15 + $0x28] sm:$0xff]  ;;  %v584_v24 = vld [vmem:[%s2119_s15 + $0x20] sm:$0xff] }
  0xa1   : > { %1285 = vmatprep.subr.mxu1 %v592_v8  ;;  %1230 = vmatpush3.msra.mxu0 %v383_v7  ;;  %v374_v25 = vld [vmem:[%s2110_s7 + $0x18] sm:$0xff]  ;;  %v373_v27 = vld [vmem:[%s2110_s7 + $0x10] sm:$0xff]  ;;  %v372_v29 = vld [vmem:[%s2110_s7 + $0x8] sm:$0xff] }
  0xa2   : > { %1286 = vmatpush3.msra.mxu1 %v592_v8  ;;  %1231 = vmatprep.subr.mxu0 %v382_v9  ;;  %v583_v26 = vld [vmem:[%s2119_s15 + $0x18] sm:$0xff]  ;;  %v582_v28 = vld [vmem:[%s2119_s15 + $0x10] sm:$0xff]  ;;  %v581_v30 = vld [vmem:[%s2119_s15 + $0x8] sm:$0xff] }
  0xa3   : > { %1287 = vmatprep.subr.mxu1 %v591_v10  ;;  %1232 = vmatpush3.msra.mxu0 %v382_v9  ;;  %v371_v31 = vld [vmem:[%s2110_s7] sm:$0xff]  ;;  %v340_v34 = vld [vmem:[%s2102_s6 + $0x8] sm:$0xff]  ;;  %v341_v35 = vld [vmem:[%s2102_s6 + $0x10] sm:$0xff] }
  0xa4   : > { %1288 = vmatpush3.msra.mxu1 %v591_v10  ;;  %1233 = vmatprep.subr.mxu0 %v381_v11  ;;  %v580_v32 = vld [vmem:[%s2119_s15] sm:$0xff]  ;;  %v342_v36 = vld [vmem:[%s2102_s6 + $0x18] sm:$0xff]  ;;  %v344_v38 = vld [vmem:[%s2102_s6 + $0x28] sm:$0xff] }
  0xa5   : > { %1289 = vmatprep.subr.mxu1 %v590_v12  ;;  %1234 = vmatpush3.msra.mxu0 %v381_v11  ;;  %v339_v33 = vld [vmem:[%s2102_s6] sm:$0xff]  ;;  %v345_v39 = vld [vmem:[%s2102_s6 + $0x30] sm:$0xff]  ;;  %v346_v40 = vld [vmem:[%s2102_s6 + $0x38] sm:$0xff] }
  0xa6   : > { %1290 = vmatpush3.msra.mxu1 %v590_v12  ;;  %1235 = vmatprep.subr.mxu0 %v380_v13  ;;  %v343_v37 = vld [vmem:[%s2102_s6 + $0x20] sm:$0xff]  ;;  %v348_v42 = vld [vmem:[%s2102_s6 + $0x48] sm:$0xff]  ;;  %v349_v43 = vld [vmem:[%s2102_s6 + $0x50] sm:$0xff] }
  0xa7   : > { %1291 = vmatprep.subr.mxu1 %v589_v14  ;;  %1236 = vmatpush3.msra.mxu0 %v380_v13  ;;  %v347_v41 = vld [vmem:[%s2102_s6 + $0x40] sm:$0xff]  ;;  %v350_v44 = vld [vmem:[%s2102_s6 + $0x58] sm:$0xff]  ;;  %v352_v46 = vld [vmem:[%s2102_s6 + $0x68] sm:$0xff] }
  0xa8   : > { %1292 = vmatpush3.msra.mxu1 %v589_v14  ;;  %1237 = vmatprep.subr.mxu0 %v379_v15  ;;  %v351_v45 = vld [vmem:[%s2102_s6 + $0x60] sm:$0xff]  ;;  %v353_v47 = vld [vmem:[%s2102_s6 + $0x70] sm:$0xff]  ;;  %v354_v48 = vld [vmem:[%s2102_s6 + $0x78] sm:$0xff] }
  0xa9   : > { %1293 = vmatprep.subr.mxu1 %v588_v16  ;;  %1238 = vmatpush3.msra.mxu0 %v379_v15  ;;  %v356_v49 = vld [vmem:[#allocation2] sm:$0xff]  ;;  %v565_v50 = vld [vmem:[#allocation3 + $0x68] sm:$0xff]  ;;  %v355_v53 = vld [vmem:[#allocation2 + $0x30] sm:$0xff] }
  0xaa   : > { %1294 = vmatpush3.msra.mxu1 %v588_v16  ;;  %1239 = vmatprep.subr.mxu0 %v378_v17  ;;  %v564_v54 = vld [vmem:[#allocation3 + $0x28] sm:$0xff]  ;;  %v358_v59 = vld [vmem:[#allocation2 + $0x18] sm:$0xff]  ;;  %v567_v60 = vld [vmem:[#allocation3 + $0x40] sm:$0xff] }
  0xab   : > { %1295 = vmatprep.subr.mxu1 %v587_v18  ;;  %1240 = vmatpush3.msra.mxu0 %v378_v17  ;;  %v357_v1 = vld [vmem:[#allocation2 + $0x58] sm:$0xff]  ;;  %v566_v2 = vld [vmem:[#allocation3 + $0x10] sm:$0xff]  ;;  %v360_v7 = vld [vmem:[#allocation2 + $0x68] sm:$0xff] }
  0xac   : > { %1296 = vmatpush3.msra.mxu1 %v587_v18  ;;  %1241 = vmatprep.subr.mxu0 %v377_v19  ;;  %v569_v8 = vld [vmem:[#allocation3 + $0x30] sm:$0xff]  ;;  %v568_v14 = vld [vmem:[#allocation3 + $0x48] sm:$0xff] }
  0xad   : > { %1297 = vmatprep.subr.mxu1 %v586_v20  ;;  %1242 = vmatpush3.msra.mxu0 %v377_v19  ;;  %v359_v13 = vld [vmem:[#allocation2 + $0x50] sm:$0xff]  ;;  %v362_v19 = vld [vmem:[#allocation2 + $0x48] sm:$0xff] }
  0xae   : > { %1298 = vmatpush3.msra.mxu1 %v586_v20  ;;  %1243 = vmatprep.subr.mxu0 %v376_v21  ;;  %v571_v20 = vld [vmem:[#allocation3 + $0x38] sm:$0xff] }
  0xaf   : > { %1299 = vmatprep.subr.mxu1 %v585_v22  ;;  %1244 = vmatpush3.msra.mxu0 %v376_v21 }
  0xb0   : > { %1300 = vmatpush3.msra.mxu1 %v585_v22  ;;  %1245 = vmatprep.subr.mxu0 %v375_v23 }
  0xb1   : > { %1301 = vmatprep.subr.mxu1 %v584_v24  ;;  %1246 = vmatpush3.msra.mxu0 %v375_v23 }
  0xb2   : > { %1302 = vmatpush3.msra.mxu1 %v584_v24  ;;  %1247 = vmatprep.subr.mxu0 %v374_v25 }
  0xb3   : > { %1303 = vmatprep.subr.mxu1 %v583_v26  ;;  %1248 = vmatpush3.msra.mxu0 %v374_v25  ;;  %v361_v25 = vld [vmem:[#allocation2 + $0x8] sm:$0xff] }
  0xb4   : > { %1304 = vmatpush3.msra.mxu1 %v583_v26  ;;  %1249 = vmatprep.subr.mxu0 %v373_v27  ;;  %v570_v26 = vld [vmem:[#allocation3 + $0x70] sm:$0xff] }
  0xb5   : > { %1305 = vmatprep.subr.mxu1 %v582_v28  ;;  %1250 = vmatpush3.msra.mxu0 %v373_v27 }
  0xb6   : > { %1306 = vmatpush3.msra.mxu1 %v582_v28  ;;  %1251 = vmatprep.subr.mxu0 %v372_v29 }
  0xb7   : > { %1307 = vmatprep.subr.mxu1 %v581_v30  ;;  %1252 = vmatpush3.msra.mxu0 %v372_v29 }
  0xb8   : > { %1308 = vmatpush3.msra.mxu1 %v581_v30  ;;  %1253 = vmatprep.subr.mxu0 %v371_v31 }
  0xb9   : > { %1309 = vmatprep.subr.mxu1 %v580_v32  ;;  %1254 = vmatpush3.msra.mxu0 %v371_v31  ;;  %v364_v31 = vld [vmem:[#allocation2 + $0x20] sm:$0xff] }
  0xba   : > { %1255 = vmatprep.mubr.f32.mxu0 %v339_v33  ;;  %1310 = vmatpush3.msra.mxu1 %v580_v32  ;;  %v573_v32 = vld [vmem:[#allocation3 + $0x78] sm:$0xff] }
  0xbb   : > { %1311 = vmatprep.mubr.f32.mxu1 %v339_v33  ;;  %1256 = vmatmul.mubr.f32.vlgmr.msra.gmra.mxu0 %v340_v34 }
  0xbc   : > { %1312 = vmatmul.mubr.f32.vlgmr.msra.gmra.mxu1 %v340_v34  ;;  %1258 = vmatprep.mubr.f32.mxu0 %v341_v35 }
  0xbd   : > { %1314 = vmatprep.mubr.f32.mxu1 %v341_v35 }
  0xbf   : > { %1259 = vmatmul.mubr.f32.gmra.mxu0 %v342_v36 }
  0xc0   : > { %1315 = vmatmul.mubr.f32.gmra.mxu1 %v342_v36  ;;  %1261 = vmatprep.mubr.f32.mxu0 %v343_v37 }
  0xc1   : > { %1317 = vmatprep.mubr.f32.mxu1 %v343_v37  ;;  %v363_v37 = vld [vmem:[#allocation2 + $0x40] sm:$0xff] }
  0xc3   : > { %1262 = vmatmul.mubr.f32.gmra.mxu0 %v344_v38 }
  0xc4   : > { %1318 = vmatmul.mubr.f32.gmra.mxu1 %v344_v38  ;;  %1264 = vmatprep.mubr.f32.mxu0 %v345_v39  ;;  %v572_v38 = vld [vmem:[#allocation3 + $0x20] sm:$0xff] }
  0xc5   : > { %1320 = vmatprep.mubr.f32.mxu1 %v345_v39 }
  0xc7   : > { %1265 = vmatmul.mubr.f32.gmra.mxu0 %v346_v40 }
  0xc8   : > { %1321 = vmatmul.mubr.f32.gmra.mxu1 %v346_v40  ;;  %1267 = vmatprep.mubr.f32.mxu0 %v347_v41 }
  0xc9   : > { %1323 = vmatprep.mubr.f32.mxu1 %v347_v41 }
  0xcb   : > { %1268 = vmatmul.mubr.f32.gmra.mxu0 %v348_v42 }
  0xcc   : > { %1324 = vmatmul.mubr.f32.gmra.mxu1 %v348_v42  ;;  %1270 = vmatprep.mubr.f32.mxu0 %v349_v43 }
  0xcd   : > { %1326 = vmatprep.mubr.f32.mxu1 %v349_v43  ;;  %v366_v43 = vld [vmem:[#allocation2 + $0x38] sm:$0xff] }
  0xcf   : > { %1271 = vmatmul.mubr.f32.gmra.mxu0 %v350_v44 }
  0xd0   : > { %1327 = vmatmul.mubr.f32.gmra.mxu1 %v350_v44  ;;  %1273 = vmatprep.mubr.f32.mxu0 %v351_v45  ;;  %v575_v44 = vld [vmem:[#allocation3 + $0x58] sm:$0xff] }
  0xd1   : > { %1329 = vmatprep.mubr.f32.mxu1 %v351_v45 }
  0xd3   : > { %1274 = vmatmul.mubr.f32.gmra.mxu0 %v352_v46 }
  0xd4   : > { %1330 = vmatmul.mubr.f32.gmra.mxu1 %v352_v46  ;;  %1276 = vmatprep.mubr.f32.mxu0 %v353_v47 }
  0xd5   : > { %1332 = vmatprep.mubr.f32.mxu1 %v353_v47 }
  0xd7   : > { %1277 = vmatmul.mubr.f32.gmra.mxu0 %v354_v48 }
  0xd8   : > { %1333 = vmatmul.mubr.f32.gmra.mxu1 %v354_v48 }
 0x17b   : > { %v1257_v51 = vpop.f32.mrf.mxu0 }
 0x17c   : > { %v1313_v52 = vpop.f32.mrf.mxu1  ;;  %v533_v55 = vadd.f32 %v1257_v51, %v356_v49  ;;  %v365_v49 = vld [vmem:[#allocation2 + $0x10] sm:$0xff] }
 0x17d   : > { %v742_v56 = vadd.f32 %v1313_v52, %v565_v50  ;;  %v453_v57 = vpop.f32.mrf.mxu0  ;;  %v574_v50 = vld [vmem:[#allocation3 + $0x18] sm:$0xff] }
 0x17e   : > { %v662_v58 = vpop.f32.mrf.mxu1  ;;  %549 = vst [vmem:[#allocation2] sm:$0xff] %v533_v55  ;;  %v532_v61 = vadd.f32 %v453_v57, %v355_v53  ;;  %v368_v55 = vld [vmem:[#allocation2 + $0x70] sm:$0xff] }
 0x17f   : > { %758 = vst [vmem:[#allocation3 + $0x68] sm:$0xff] %v742_v56  ;;  %v741_v62 = vadd.f32 %v662_v58, %v564_v54  ;;  %v1260_v63 = vpop.f32.mrf.mxu0  ;;  %v577_v56 = vld [vmem:[#allocation3 + $0x8] sm:$0xff] }
 0x180   : > { %v1316_v0 = vpop.f32.mrf.mxu1  ;;  %548 = vst [vmem:[#allocation2 + $0x30] sm:$0xff] %v532_v61  ;;  %v535_v3 = vadd.f32 %v1260_v63, %v358_v59  ;;  %v367_v61 = vld [vmem:[#allocation2 + $0x60] sm:$0xff] }
 0x181   : > { %757 = vst [vmem:[#allocation3 + $0x28] sm:$0xff] %v741_v62  ;;  %v744_v4 = vadd.f32 %v1316_v0, %v567_v60  ;;  %v463_v5 = vpop.f32.mrf.mxu0  ;;  %v576_v62 = vld [vmem:[#allocation3] sm:$0xff] }
 0x182   : > { %v672_v6 = vpop.f32.mrf.mxu1  ;;  %551 = vst [vmem:[#allocation2 + $0x18] sm:$0xff] %v535_v3  ;;  %v534_v9 = vadd.f32 %v463_v5, %v357_v1  ;;  %v370_v3 = vld [vmem:[#allocation2 + $0x28] sm:$0xff] }
 0x183   : > { %760 = vst [vmem:[#allocation3 + $0x40] sm:$0xff] %v744_v4  ;;  %v743_v10 = vadd.f32 %v672_v6, %v566_v2  ;;  %v1263_v11 = vpop.f32.mrf.mxu0  ;;  %v579_v4 = vld [vmem:[#allocation3 + $0x50] sm:$0xff] }
 0x184   : > { %v1319_v12 = vpop.f32.mrf.mxu1  ;;  %550 = vst [vmem:[#allocation2 + $0x58] sm:$0xff] %v534_v9  ;;  %v537_v15 = vadd.f32 %v1263_v11, %v360_v7  ;;  %v369_v9 = vld [vmem:[#allocation2 + $0x78] sm:$0xff] }
 0x185   : > { %759 = vst [vmem:[#allocation3 + $0x10] sm:$0xff] %v743_v10  ;;  %v746_v16 = vadd.f32 %v1319_v12, %v569_v8  ;;  %v473_v17 = vpop.f32.mrf.mxu0  ;;  %v578_v10 = vld [vmem:[#allocation3 + $0x60] sm:$0xff] }
 0x186   : > { %v682_v18 = vpop.f32.mrf.mxu1  ;;  %553 = vst [vmem:[#allocation2 + $0x68] sm:$0xff] %v537_v15  ;;  %v536_v21 = vadd.f32 %v473_v17, %v359_v13 }
 0x187   : > { %762 = vst [vmem:[#allocation3 + $0x30] sm:$0xff] %v746_v16  ;;  %v745_v22 = vadd.f32 %v682_v18, %v568_v14  ;;  %v1266_v23 = vpop.f32.mrf.mxu0 }
 0x188   : > { %v1322_v24 = vpop.f32.mrf.mxu1  ;;  %552 = vst [vmem:[#allocation2 + $0x50] sm:$0xff] %v536_v21  ;;  %v539_v27 = vadd.f32 %v1266_v23, %v362_v19 }
 0x189   : > { %761 = vst [vmem:[#allocation3 + $0x48] sm:$0xff] %v745_v22  ;;  %v748_v28 = vadd.f32 %v1322_v24, %v571_v20  ;;  %v483_v29 = vpop.f32.mrf.mxu0 }
 0x18a   : > { %v692_v30 = vpop.f32.mrf.mxu1  ;;  %555 = vst [vmem:[#allocation2 + $0x48] sm:$0xff] %v539_v27  ;;  %v538_v33 = vadd.f32 %v483_v29, %v361_v25 }
 0x18b   : > { %764 = vst [vmem:[#allocation3 + $0x38] sm:$0xff] %v748_v28  ;;  %v747_v34 = vadd.f32 %v692_v30, %v570_v26  ;;  %v1269_v35 = vpop.f32.mrf.mxu0 }
 0x18c   : > { %v1325_v36 = vpop.f32.mrf.mxu1  ;;  %554 = vst [vmem:[#allocation2 + $0x8] sm:$0xff] %v538_v33  ;;  %v541_v39 = vadd.f32 %v1269_v35, %v364_v31 }
 0x18d   : > { %763 = vst [vmem:[#allocation3 + $0x70] sm:$0xff] %v747_v34  ;;  %v750_v40 = vadd.f32 %v1325_v36, %v573_v32  ;;  %v493_v41 = vpop.f32.mrf.mxu0 }
 0x18e   : > { %v702_v42 = vpop.f32.mrf.mxu1  ;;  %557 = vst [vmem:[#allocation2 + $0x20] sm:$0xff] %v541_v39  ;;  %v540_v45 = vadd.f32 %v493_v41, %v363_v37 }
 0x18f   : > { %766 = vst [vmem:[#allocation3 + $0x78] sm:$0xff] %v750_v40  ;;  %v749_v46 = vadd.f32 %v702_v42, %v572_v38  ;;  %v1272_v47 = vpop.f32.mrf.mxu0 }
 0x190   : > { %v1328_v48 = vpop.f32.mrf.mxu1  ;;  %556 = vst [vmem:[#allocation2 + $0x40] sm:$0xff] %v540_v45  ;;  %v543_v51 = vadd.f32 %v1272_v47, %v366_v43 }
 0x191   : > { %765 = vst [vmem:[#allocation3 + $0x20] sm:$0xff] %v749_v46  ;;  %v752_v52 = vadd.f32 %v1328_v48, %v575_v44  ;;  %v503_v53 = vpop.f32.mrf.mxu0 }
 0x192   : > { %v712_v54 = vpop.f32.mrf.mxu1  ;;  %559 = vst [vmem:[#allocation2 + $0x38] sm:$0xff] %v543_v51  ;;  %v542_v57 = vadd.f32 %v503_v53, %v365_v49 }
 0x193   : > { %768 = vst [vmem:[#allocation3 + $0x58] sm:$0xff] %v752_v52  ;;  %v751_v58 = vadd.f32 %v712_v54, %v574_v50  ;;  %v1275_v59 = vpop.f32.mrf.mxu0 }
 0x194   : > { %v1331_v60 = vpop.f32.mrf.mxu1  ;;  %558 = vst [vmem:[#allocation2 + $0x10] sm:$0xff] %v542_v57  ;;  %v545_v63 = vadd.f32 %v1275_v59, %v368_v55 }
 0x195   : > { %767 = vst [vmem:[#allocation3 + $0x18] sm:$0xff] %v751_v58  ;;  %v754_v0 = vadd.f32 %v1331_v60, %v577_v56  ;;  %v513_v1 = vpop.f32.mrf.mxu0 }
 0x196   : > { %v722_v2 = vpop.f32.mrf.mxu1  ;;  %561 = vst [vmem:[#allocation2 + $0x70] sm:$0xff] %v545_v63  ;;  %v544_v5 = vadd.f32 %v513_v1, %v367_v61 }
 0x197   : > { %770 = vst [vmem:[#allocation3 + $0x8] sm:$0xff] %v754_v0  ;;  %v753_v6 = vadd.f32 %v722_v2, %v576_v62  ;;  %v1278_v7 = vpop.f32.mrf.mxu0 }
 0x198   : > { %v1334_v8 = vpop.f32.mrf.mxu1  ;;  %560 = vst [vmem:[#allocation2 + $0x60] sm:$0xff] %v544_v5  ;;  %v547_v11 = vadd.f32 %v1278_v7, %v370_v3 }
 0x199   : > { %769 = vst [vmem:[#allocation3] sm:$0xff] %v753_v6  ;;  %v756_v12 = vadd.f32 %v1334_v8, %v579_v4  ;;  %v523_v13 = vpop.f32.mrf.mxu0  ;;  %776 = sbr.rel (%p1132_p7) target bundleno = 465 (0x1d1), region = 52 }
 0x19a   : > { %v732_v14 = vpop.f32.mrf.mxu1  ;;  %563 = vst [vmem:[#allocation2 + $0x28] sm:$0xff] %v547_v11  ;;  %v546_v15 = vadd.f32 %v523_v13, %v369_v9 }
 0x19b   : > { %772 = vst [vmem:[#allocation3 + $0x50] sm:$0xff] %v756_v12  ;;  %v755_v16 = vadd.f32 %v732_v14, %v578_v10 }
 0x19c   : > { %562 = vst [vmem:[#allocation2 + $0x78] sm:$0xff] %v546_v15 }
 0x19d   : > { %771 = vst [vmem:[#allocation3 + $0x60] sm:$0xff] %v755_v16 }
 0x19e   : > { %v2173_v17 = vld [vmem:[#allocation2 + $0x30] sm:$0xff]  ;;  %v2175_v18 = vld [vmem:[#allocation2] sm:$0xff]  ;;  %v2179_v21 = vld [vmem:[#allocation2 + $0x58] sm:$0xff] }
 0x19f   : > { %v1133_v19 = vmul.f32 -1.442695, %v2173_v17  ;;  %v1134_v20 = vmul.f32 -1.442695, %v2175_v18  ;;  %v1135_v22 = vmul.f32 -1.442695, %v2179_v21 }
 0x1a0   : > { %v2182_v23 = vld [vmem:[#allocation2 + $0x18] sm:$0xff]  ;;  %v2185_v25 = vld [vmem:[#allocation2 + $0x50] sm:$0xff]  ;;  %v2187_v26 = vld [vmem:[#allocation2 + $0x68] sm:$0xff] }
 0x1a1   : > { %1495 = vpow2.f32 %v1133_v19  ;;  %v1136_v24 = vmul.f32 -1.442695, %v2182_v23  ;;  %v1137_v27 = vmul.f32 -1.442695, %v2185_v25  ;;  %v1138_v28 = vmul.f32 -1.442695, %v2187_v26 }
 0x1a2   : > { %1497 = vpow2.f32 %v1134_v20  ;;  %v2191_v29 = vld [vmem:[#allocation2 + $0x8] sm:$0xff]  ;;  %v2197_v33 = vld [vmem:[#allocation2 + $0x40] sm:$0xff]  ;;  %v2202_v36 = vld [vmem:[#allocation2 + $0x10] sm:$0xff] }
 0x1a3   : > { %1499 = vpow2.f32 %v1135_v22  ;;  %v1139_v30 = vmul.f32 -1.442695, %v2191_v29  ;;  %v2194_v31 = vld [vmem:[#allocation2 + $0x48] sm:$0xff]  ;;  %v2199_v34 = vld [vmem:[#allocation2 + $0x20] sm:$0xff]  ;;  %v1141_v35 = vmul.f32 -1.442695, %v2197_v33 }
 0x1a4   : > { %1501 = vpow2.f32 %v1136_v24  ;;  %v1140_v32 = vmul.f32 -1.442695, %v2194_v31  ;;  %v1142_v37 = vmul.f32 -1.442695, %v2199_v34  ;;  %v2205_v38 = vld [vmem:[#allocation2 + $0x38] sm:$0xff]  ;;  %v2208_v40 = vld [vmem:[#allocation2 + $0x60] sm:$0xff] }
 0x1a5   : > { %1503 = vpow2.f32 %v1137_v27  ;;  %v1143_v39 = vmul.f32 -1.442695, %v2202_v36  ;;  %v2210_v41 = vld [vmem:[#allocation2 + $0x70] sm:$0xff]  ;;  %v1144_v42 = vmul.f32 -1.442695, %v2205_v38  ;;  %v2213_v43 = vld [vmem:[#allocation2 + $0x78] sm:$0xff] }
 0x1a6   : > { %1505 = vpow2.f32 %v1138_v28  ;;  %v1145_v44 = vmul.f32 -1.442695, %v2208_v40  ;;  %v2216_v45 = vld [vmem:[#allocation2 + $0x28] sm:$0xff]  ;;  %v1146_v46 = vmul.f32 -1.442695, %v2210_v41  ;;  %v795_v11 = vld [vmem:[#allocation3 + $0x10] sm:$0xff] }
 0x1a7   : > { %1507 = vpow2.f32 %v1139_v30  ;;  %v1147_v47 = vmul.f32 -1.442695, %v2213_v43  ;;  %v1148_v48 = vmul.f32 -1.442695, %v2216_v45  ;;  %v793_v5 = vld [vmem:[#allocation3 + $0x28] sm:$0xff]  ;;  %v796_v15 = vld [vmem:[#allocation3 + $0x40] sm:$0xff]  ;;  %v811_v28 = vmul.f32 %v795_v11, %v2179_v21 }
 0x1a8   : > { %1509 = vpow2.f32 %v1140_v32  ;;  %v794_v8 = vld [vmem:[#allocation3 + $0x68] sm:$0xff]  ;;  %v809_v14 = vmul.f32 %v793_v5, %v2173_v17  ;;  %v798_v30 = vld [vmem:[#allocation3 + $0x30] sm:$0xff] }
 0x1a9   : > { %1511 = vpow2.f32 %v1141_v35  ;;  %v810_v20 = vmul.f32 %v794_v8, %v2175_v18  ;;  %v797_v22 = vld [vmem:[#allocation3 + $0x48] sm:$0xff]  ;;  %v799_v17 = vld [vmem:[#allocation3 + $0x70] sm:$0xff] }
 0x1aa   : > { %1513 = vpow2.f32 %v1142_v37  ;;  %v812_v37 = vmul.f32 %v796_v15, %v2182_v23  ;;  %v813_v18 = vmul.f32 %v797_v22, %v2185_v25 }
 0x1ab   : > { %1515 = vpow2.f32 %v1143_v39 }
 0x1ac   : > { %1517 = vpow2.f32 %v1144_v42 }
 0x1ad   : > { %1519 = vpow2.f32 %v1145_v44 }
 0x1ae   : > { %v1496_v49 = vpop.eup %1495  ;;  %1521 = vpow2.f32 %v1146_v46  ;;  %v800_v46 = vld [vmem:[#allocation3 + $0x38] sm:$0xff] }
 0x1af   : > { %v1498_v50 = vpop.eup %1497  ;;  %v873_v51 = vadd.f32 1.0, %v1496_v49  ;;  %1523 = vpow2.f32 %v1147_v47  ;;  %v801_v49 = vld [vmem:[#allocation3 + $0x20] sm:$0xff] }
 0x1b0   : > { %v1500_v52 = vpop.eup %1499  ;;  %v874_v53 = vadd.f32 1.0, %v1498_v50  ;;  %1525 = vpow2.f32 %v1148_v48  ;;  %v814_v48 = vmul.f32 %v798_v30, %v2187_v26 }
 0x1b1   : > { %v1502_v54 = vpop.eup %1501  ;;  %1527 = vrcp.f32 %v873_v51  ;;  %v875_v55 = vadd.f32 1.0, %v1500_v52  ;;  %v815_v51 = vmul.f32 %v799_v17, %v2191_v29  ;;  %v802_v52 = vld [vmem:[#allocation3 + $0x78] sm:$0xff] }
 0x1b2   : > { %v1504_v56 = vpop.eup %1503  ;;  %1529 = vrcp.f32 %v874_v53  ;;  %v876_v57 = vadd.f32 1.0, %v1502_v54  ;;  %v816_v54 = vmul.f32 %v800_v46, %v2194_v31  ;;  %v818_v29 = vmul.f32 %v802_v52, %v2199_v34 }
 0x1b3   : > { %v1506_v58 = vpop.eup %1505  ;;  %1531 = vrcp.f32 %v875_v55  ;;  %v877_v59 = vadd.f32 1.0, %v1504_v56  ;;  %v803_v55 = vld [vmem:[#allocation3 + $0x18] sm:$0xff] }
 0x1b4   : > { %v1508_v60 = vpop.eup %1507  ;;  %1533 = vrcp.f32 %v876_v57  ;;  %v878_v61 = vadd.f32 1.0, %v1506_v58  ;;  %v817_v57 = vmul.f32 %v801_v49, %v2197_v33  ;;  %v804_v58 = vld [vmem:[#allocation3 + $0x58] sm:$0xff]  ;;  %v819_v31 = vmul.f32 %v803_v55, %v2202_v36 }
 0x1b5   : > { %v1510_v62 = vpop.eup %1509  ;;  %1535 = vrcp.f32 %v877_v59  ;;  %v879_v63 = vadd.f32 1.0, %v1508_v60  ;;  %v820_v33 = vmul.f32 %v804_v58, %v2205_v38 }
 0x1b6   : > { %v1512_v0 = vpop.eup %1511  ;;  %1537 = vrcp.f32 %v878_v61  ;;  %v880_v1 = vadd.f32 1.0, %v1510_v62  ;;  %v805_v61 = vld [vmem:[#allocation3] sm:$0xff] }
 0x1b7   : > { %v1514_v2 = vpop.eup %1513  ;;  %1539 = vrcp.f32 %v879_v63  ;;  %v881_v3 = vadd.f32 1.0, %v1512_v0  ;;  %v806_v0 = vld [vmem:[#allocation3 + $0x8] sm:$0xff]  ;;  %v821_v34 = vmul.f32 %v805_v61, %v2208_v40 }
 0x1b8   : > { %v1516_v4 = vpop.eup %1515  ;;  %1541 = vrcp.f32 %v880_v1  ;;  %v882_v6 = vadd.f32 1.0, %v1514_v2  ;;  %v822_v8 = vmul.f32 %v806_v0, %v2210_v41 }
 0x1b9   : > { %v1518_v7 = vpop.eup %1517  ;;  %1543 = vrcp.f32 %v881_v3  ;;  %v883_v9 = vadd.f32 1.0, %v1516_v4  ;;  %v807_v3 = vld [vmem:[#allocation3 + $0x60] sm:$0xff] }
 0x1ba   : > { %v1520_v10 = vpop.eup %1519  ;;  %1545 = vrcp.f32 %v882_v6  ;;  %v884_v12 = vadd.f32 1.0, %v1518_v7  ;;  %v808_v6 = vld [vmem:[#allocation3 + $0x50] sm:$0xff] }
 0x1bb   : > { %v1522_v13 = vpop.eup %1521  ;;  %1547 = vrcp.f32 %v883_v9  ;;  %v885_v16 = vadd.f32 1.0, %v1520_v10  ;;  %v823_v10 = vmul.f32 %v807_v3, %v2213_v43  ;;  %v824_v40 = vmul.f32 %v808_v6, %v2216_v45 }
 0x1bc   : > { %v1524_v19 = vpop.eup %1523  ;;  %1549 = vrcp.f32 %v884_v12  ;;  %v886_v24 = vadd.f32 1.0, %v1522_v13 }
 0x1bd   : > { %v1526_v27 = vpop.eup %1525  ;;  %1551 = vrcp.f32 %v885_v16  ;;  %v887_v32 = vadd.f32 1.0, %v1524_v19 }
 0x1be   : > { %v1528_v35 = vpop.eup %1527  ;;  %1553 = vrcp.f32 %v886_v24  ;;  %v888_v39 = vadd.f32 1.0, %v1526_v27 }
 0x1bf   : > { %v1530_v42 = vpop.eup %1529  ;;  %v921_v44 = vmul.f32 %v1528_v35, %v809_v14  ;;  %1555 = vrcp.f32 %v887_v32 }
 0x1c0   : > { %v1532_v47 = vpop.eup %1531  ;;  %v922_v21 = vmul.f32 %v1530_v42, %v810_v20  ;;  %1557 = vrcp.f32 %v888_v39 }
 0x1c1   : > { %v1534_v50 = vpop.eup %1533  ;;  %937 = vst [vmem:[%s2121_s11] sm:$0xff] %v921_v44  ;;  %v923_v23 = vmul.f32 %v1532_v47, %v811_v28 }
 0x1c2   : > { %v1536_v53 = vpop.eup %1535  ;;  %938 = vst [vmem:[%s2121_s11 + $0x8] sm:$0xff] %v922_v21  ;;  %v924_v25 = vmul.f32 %v1534_v50, %v812_v37 }
 0x1c3   : > { %v1538_v56 = vpop.eup %1537  ;;  %939 = vst [vmem:[%s2121_s11 + $0x10] sm:$0xff] %v923_v23  ;;  %v925_v26 = vmul.f32 %v1536_v53, %v813_v18 }
 0x1c4   : > { %v1540_v59 = vpop.eup %1539  ;;  %940 = vst [vmem:[%s2121_s11 + $0x18] sm:$0xff] %v924_v25  ;;  %v926_v60 = vmul.f32 %v1538_v56, %v814_v48 }
 0x1c5   : > { %v1542_v62 = vpop.eup %1541  ;;  %941 = vst [vmem:[%s2121_s11 + $0x20] sm:$0xff] %v925_v26  ;;  %v927_v63 = vmul.f32 %v1540_v59, %v815_v51 }
 0x1c6   : > { %v1544_v1 = vpop.eup %1543  ;;  %942 = vst [vmem:[%s2121_s11 + $0x28] sm:$0xff] %v926_v60  ;;  %v928_v2 = vmul.f32 %v1542_v62, %v816_v54 }
 0x1c7   : > { %v1546_v4 = vpop.eup %1545  ;;  %943 = vst [vmem:[%s2121_s11 + $0x30] sm:$0xff] %v927_v63  ;;  %v929_v5 = vmul.f32 %v1544_v1, %v817_v57 }
 0x1c8   : > { %v1548_v7 = vpop.eup %1547  ;;  %944 = vst [vmem:[%s2121_s11 + $0x38] sm:$0xff] %v928_v2  ;;  %v930_v36 = vmul.f32 %v1546_v4, %v818_v29 }
 0x1c9   : > { %v1550_v9 = vpop.eup %1549  ;;  %945 = vst [vmem:[%s2121_s11 + $0x40] sm:$0xff] %v929_v5  ;;  %v931_v38 = vmul.f32 %v1548_v7, %v819_v31 }
 0x1ca   : > { %v1552_v11 = vpop.eup %1551  ;;  %946 = vst [vmem:[%s2121_s11 + $0x48] sm:$0xff] %v930_v36  ;;  %v932_v12 = vmul.f32 %v1550_v9, %v820_v33 }
 0x1cb   : > { %v1554_v13 = vpop.eup %1553  ;;  %947 = vst [vmem:[%s2121_s11 + $0x50] sm:$0xff] %v931_v38  ;;  %v933_v14 = vmul.f32 %v1552_v11, %v821_v34 }
 0x1cc   : > { %v1556_v15 = vpop.eup %1555  ;;  %948 = vst [vmem:[%s2121_s11 + $0x58] sm:$0xff] %v932_v12  ;;  %v934_v41 = vmul.f32 %v1554_v13, %v822_v8 }
 0x1cd   : > { %v1558_v16 = vpop.eup %1557  ;;  %949 = vst [vmem:[%s2121_s11 + $0x60] sm:$0xff] %v933_v14  ;;  %v935_v19 = vmul.f32 %v1556_v15, %v823_v10 }
 0x1ce   : > { %950 = vst [vmem:[%s2121_s11 + $0x68] sm:$0xff] %v934_v41  ;;  %v936_v20 = vmul.f32 %v1558_v16, %v824_v40 }
 0x1cf   : > { %951 = vst [vmem:[%s2121_s11 + $0x70] sm:$0xff] %v935_v19 }
 0x1d0   : > { %952 = vst [vmem:[%s2121_s11 + $0x78] sm:$0xff] %v936_v20 }
 0x1d1 PF: > { %s2408_s4 = sld [smem:[#allocation19_spill]]  ;;  %s969_s3 = sshll.u32 %s2121_s11, 4  ;;  %s2256_s3 = int_to_ptr.vmem [resolvable:$true] %s969_s3 }
 0x1d2   : > { %s2409_s21 = sld [smem:[#allocation18_spill]]  ;;  %s2265_s22 = scalar_lea.sflag [#allocation6], %s296_s25 }
 0x1d3   : > { %s2410_s9 = sld [smem:[#allocation26_spill]]  ;;  %s1643_s23 = scalar_lea.vmem %s2256_s3, 2048 }
 0x1d4   : > { %s2411_s5 = sld [smem:[#allocation30_spill]]  ;;  %p1644_p0 = scmp.ne.s32.totalorder %s2256_s3, %s1643_s23 }
 0x1d5   : > { %s1817_s0 = smov [#allocation10]  }
 0x1d6   : > { %s1647_s7 = sshll.u32 %s1817_s0, 4  ;;  %s1648_s7 = int_to_ptr.vmem [resolvable:$false] %s1647_s7 }
 0x1d7   : > { %s1158_s18 = sshll.u32 %s2408_s4, 6  ;;  %s1649_s29 = scalar_lea.vmem %s1648_s7, 4096 }
 0x1d8   : > { %s966_s8 = sadd.s32 %s2409_s21, %s1158_s18  ;;  %p1650_p11 = scmp.lt.s32.totalorder %s2256_s3, %s1648_s7 }
 0x1d9   : > { %s1152_s16 = sshll.u32 %s966_s8, 7  ;;  %p2412_p3 = scmp.ne.s32.totalorder %s2410_s9, 0 }
 0x1da   : > { %s2261_s17 = scalar_lea.hbm %s2411_s5, %s1152_s16  ;;  %p1651_p13 = scmp.lt.s32.totalorder %s1649_s29, %s1643_s23 }
 0x1db   : > { %p1645_p5 = pnand %p1644_p0, %p2412_p3 }
 0x1dc   : > { %p1652_p1 = por %p1651_p13, %p1650_p11 }
 0x1dd   : > { %p1646_p8 = pneg %p1645_p5 }
 0x1df   : > { %p1653_p4 = pnand %p1652_p1, %p1646_p8 }
 0x1e1   : > { %1656 = shalt.err (!%p1653_p4)
}
 0x1e2   : > { %s1657_s25 = scalar_lea.hbm %s2261_s17, 2048  ;;  %s1661_s30 = scalar_lea.hbm %s2411_s5, 24576 }
 0x1e3   : > { %p1658_p12 = scmp.ne.s32.totalorder %s2261_s17, %s1657_s25  ;;  %p1662_p9 = scmp.lt.s32.totalorder %s2261_s17, %s2411_s5 }
 0x1e4   : > { %p1663_p10 = scmp.lt.s32.totalorder %s1661_s30, %s1657_s25 }
 0x1e5   : > { %p1659_p6 = pnand %p1658_p12, %p2412_p3 }
 0x1e6   : > { %p1664_p7 = por %p1663_p10, %p1662_p9 }
 0x1e7   : > { %p1660_p2 = pneg %p1659_p6 }
 0x1e9   : > { %p1665_p0 = pnand %p1664_p7, %p1660_p2 }
 0x1eb   : > { %1668 = shalt.err (!%p1665_p0)
}
 0x1ec   : > { %s1818_s21 = smov 128   ;;  %s1819_s18 = smov 512  }
 0x1ed   : > { %s1820_s8 = smov 8  }
 0x1ee   : > { %1341 = dma.vmem_to_hbm [thread:$0]  (%p2412_p3), %s2256_s3, 2048, %s2261_s17, %s2265_s22, %s1818_s21, %s1819_s18, %s1820_s8  }
 0x1ef PF: > { %s2413_s16 = sld [smem:[#allocation14_spill]]  ;;  %p1358_p5 = scmp.ge.s32.totalorder %s1807_s27, 2 }
 0x1f0   : > { %p2414_p8 = scmp.ne.s32.totalorder %s2396_s1, 0 }
 0x1f2   : > { %p1354_p11 = pnand %p1358_p5, %p2414_p8 }
 0x1f4   : > { %p1355_p13 = pneg %p1354_p11 }
 0x1f5   : > { %s984_s6 = sand.u32 1, %s2413_s16  }
 0x1f6   : > { %s985_s10 = scalar_lea.sflag [#allocation6], %s984_s6 }
 0x1f7   : > { %1742 = dma.done.wait (%p1355_p13), %s985_s10, 2048  }
 0x1f8   : > { %1744 = vsyncadd (%p1355_p13), %s985_s10, 4294965248  ;;  %s22_s27 = sadd.s32 1, %s1807_s27   ;;  %s2416_s15 = sld [smem:[#allocation15_spill]] }
 0x1f9   : > { %p2293_p1 = scmp.ge.s32.totalorder %s22_s27, 26   ;;  %s2417_s16 = sld [smem:[#allocation16_spill]] }
 0x1fa   : > { %s2418_s17 = sld [smem:[#allocation24_spill]]  ;;  %s2423_s12 = smov %s1751_s13 }
 0x1fb   : > { %s2419_s22 = sld [smem:[#allocation20_spill]]  ;;  %s2425_s13 = smov %s1755_s14 }
 0x1fc   : > { %s2420_s1 = sld [smem:[#allocation21_spill]]  ;;  %s2426_s14 = smov %s2056_s2 }
 0x1fd   : > { %s2421_s25 = sld [smem:[#allocation22_spill]]  ;;  %s2427_s18 = smov %s1775_s19 }
 0x1fe   : > { %s2422_s9 = sld [smem:[#allocation25_spill]]  ;;  %s2428_s19 = smov %s1779_s20 }
 0x1ff   : > { %s2429_s20 = smov %s2053_s28  ;;  %s2430_s21 = smov %s1795_s24 }
 0x200   : > { %s2431_s23 = smov %s1803_s26  ;;  %21 = sbr.rel (!%p2293_p1) target bundleno = 18 (0x12), region = 109 }
 0x202   : > { %s2432_s24 = smov %s2420_s1 }
 0x204   : > { %s2433_s26 = smov %s2422_s9 }
 0x205   :  { %990 = vsyncpa [#allocation5], 1 }
 0x206   :  { %992 = vsyncpa [#allocation5 + $0x1], 1 }
 0x207   :  { %993 = vsyncpa [#allocation8], 1 }
 0x208   :  { %995 = vsyncpa [#allocation8 + $0x1], 1 }
 0x209   :  { %996 = vsyncpa [#allocation6], 1 }
 0x20a   :  { %998 = vsyncpa [#allocation6 + $0x1], 1 }

</bundles_post_ra>
